<compile_context>
chip_gen: v7x
topology: tpu7x:2x2x1
jax: 0.10.0
libtpu: 0.0.40
codegen_flags: <defaults>
</compile_context>

<pallas_src>
import math

import jax
import jax.numpy as jnp
from jax.experimental import pallas as pl
from jax.experimental.pallas import tpu as pltpu

_LANE = 128


def _amp_nonlin_kernel(x_ref, w1_ref, b1_ref, w2_ref, b2_ref, o_ref):
    # x_ref / o_ref : (R, 128) f32 VMEM, lanes interleaved [I0, Q0, I1, Q1, ...]
    # w1_ref / b1_ref / w2_ref : (H,) f32 SMEM ;  b2_ref : (1,) f32 SMEM
    x = x_ref[...]
    sq = x * x

    # amp_sq per (I, Q) lane pair, replicated onto both lanes of the pair.
    lanes = x.shape[-1]                                     # 128 (static)
    lane_idx = jax.lax.broadcasted_iota(jnp.int32, x.shape, dimension=x.ndim - 1)
    is_even = (lane_idx % 2) == 0
    nxt = pltpu.roll(sq, lanes - 1, axis=1)                 # nxt[i] = sq[i + 1]
    prv = pltpu.roll(sq, 1, axis=1)                         # prv[i] = sq[i - 1]
    amp = sq + jnp.where(is_even, nxt, prv)

    # 1 -> H (SiLU) -> 1 MLP, unrolled over H with scalar SMEM params.
    h_dim = w1_ref.shape[0]
    scaling = jnp.full_like(amp, b2_ref[0])
    for h in range(h_dim):
        pre = amp * w1_ref[h] + b1_ref[h]
        sig = 0.5 * (jnp.tanh(0.5 * pre) + 1.0)             # sigmoid via a single EUP tanh
        scaling = scaling + w2_ref[h] * (pre * sig)         # += w2[h] * silu(pre)

    o_ref[...] = x * scaling


def amplitude_aware_nonlin(x, w1, b1, w2, b2, *, block_rows=1024):
    """x: (..., 2).  w1:(H,1) b1:(H,) w2:(1,H) b2:(1,)  (PyTorch Linear shapes)."""
    orig_shape = x.shape
    orig_dtype = x.dtype
    assert orig_shape[-1] == 2, "last dim must be 2 (real/imag)"
    hidden = w1.shape[0]
    n = math.prod(orig_shape)                      # = 2 * M, always even

    flat = x.astype(jnp.float32).reshape(n)        # contiguous view, no transpose
    n_pad = pl.cdiv(n, _LANE) * _LANE
    if n_pad != n:                                 # rare tail pad (< 128 elements)
        flat = jnp.pad(flat, (0, n_pad - n))
    rows = n_pad // _LANE
    x2 = flat.reshape(rows, _LANE)                 # lane-dense slab, still a free reshape

    if rows <= block_rows:
        br = rows                                  # full-extent block (always legal)
    else:
        br = max(8, (block_rows // 8) * 8)         # sublane-aligned block rows
    grid = (pl.cdiv(rows, br),)                    # ragged final block handled by Pallas

    w1_k = w1.reshape(hidden).astype(jnp.float32)
    b1_k = b1.reshape(hidden).astype(jnp.float32)
    w2_k = w2.reshape(hidden).astype(jnp.float32)
    b2_k = b2.reshape(1).astype(jnp.float32)

    n_lanes = rows * _LANE
    cost = pl.CostEstimate(
        flops=int(n_lanes * (8 + 8 * hidden)),
        transcendentals=int(n_lanes * hidden),
        bytes_accessed=int(2 * n_lanes * 4 + (3 * hidden + 1) * 4),
    )

    smem = pl.BlockSpec(memory_space=pltpu.MemorySpace.SMEM)

    out2 = pl.pallas_call(
        _amp_nonlin_kernel,
        out_shape=jax.ShapeDtypeStruct((rows, _LANE), jnp.float32),
        grid_spec=pltpu.PrefetchScalarGridSpec(
            num_scalar_prefetch=0,
            grid=grid,
            in_specs=[
                pl.BlockSpec((br, _LANE), lambda i: (i, 0)),
                smem, smem, smem, smem,
            ],
            out_specs=pl.BlockSpec((br, _LANE), lambda i: (i, 0)),
        ),
        compiler_params=pltpu.CompilerParams(
            dimension_semantics=("parallel",)),
        cost_estimate=cost,
    )(x2, w1_k, b1_k, w2_k, b2_k)

    out = out2.reshape(n_pad)
    if n_pad != n:
        out = out[:n]
    return out.reshape(orig_shape).astype(orig_dtype)


def amplitude_aware_nonlin_ref(x, w1, b1, w2, b2):
    """Pure-JAX reference mirroring the PyTorch forward."""
    amp_sq = (x[..., 0] ** 2 + x[..., 1] ** 2)[..., None]      # (..., 1)
    h = amp_sq @ w1.T + b1                                     # (..., H)
    h = h * jax.nn.sigmoid(h)                                  # SiLU
    scaling = h @ w2.T + b2                                    # (..., 1)
    return x * scaling


def init_params(key, hidden_size=16, random_last_layer=False):
    k1, k2, k3, k4 = jax.random.split(key, 4)
    # Linear(1, H): PyTorch uniform bound = 1/sqrt(in_features) = 1
    w1 = jax.random.uniform(k1, (hidden_size, 1), jnp.float32, -1.0, 1.0)
    b1 = jax.random.uniform(k2, (hidden_size,), jnp.float32, -1.0, 1.0)
    if random_last_layer:
        bound = 1.0 / math.sqrt(hidden_size)
        w2 = jax.random.uniform(k3, (1, hidden_size), jnp.float32, -bound, bound)
        b2 = jax.random.uniform(k4, (1,), jnp.float32, -bound, bound)
    else:
        # Matches the module's __init__: last layer weight zeroed, bias = 1.0
        w2 = jnp.zeros((1, hidden_size), jnp.float32)
        b2 = jnp.ones((1,), jnp.float32)
    return w1, b1, w2, b2


if __name__ == "__main__":
    key = jax.random.PRNGKey(0)
    kx, kp, kx2, kp2 = jax.random.split(key, 4)

    # Case 1: module-default init (zeroed last weight / unit bias), small 4-D input.
    x = jax.random.normal(kx, (2, 8, 16, 2), dtype=jnp.float32)
    params = init_params(kp, hidden_size=16, random_last_layer=False)
    out = jax.block_until_ready(amplitude_aware_nonlin(x, *params))
    ref = amplitude_aware_nonlin_ref(x, *params)
    assert out.shape == x.shape and out.dtype == x.dtype
    assert jnp.allclose(out, ref, atol=1e-5, rtol=1e-5), "mismatch (default init)"

    # Case 2: random last layer + a non-128-multiple shape so the amp pairing,
    # MLP math and tail-padding path are genuinely exercised (case 1 has scaling == 1).
    x2 = jax.random.normal(kx2, (3, 5, 7, 2), dtype=jnp.float32)
    params2 = init_params(kp2, hidden_size=16, random_last_layer=True)
    out2 = jax.block_until_ready(amplitude_aware_nonlin(x2, *params2))
    ref2 = amplitude_aware_nonlin_ref(x2, *params2)
    assert out2.shape == x2.shape
    assert jnp.allclose(out2, ref2, atol=1e-4, rtol=1e-4), "mismatch (random init)"

    print("KERNEL_OK")
</pallas_src>

<mosaic_0001>
module attributes {stable_mosaic.version = 11 : i64} {
  func.func @_amp_nonlin_kernel(%arg0: i32, %arg1: memref<4x128xf32, #tpu.memory_space<vmem>>, %arg2: memref<16xf32, #tpu.memory_space<smem>>, %arg3: memref<16xf32, #tpu.memory_space<smem>>, %arg4: memref<16xf32, #tpu.memory_space<smem>>, %arg5: memref<1xf32, #tpu.memory_space<smem>>, %arg6: memref<4x128xf32, #tpu.memory_space<vmem>>) attributes {dimension_semantics = [#tpu.dimension_semantics<parallel>], iteration_bounds = array<i64: 1>, scalar_prefetch = 0 : i64, scratch_operands = 0 : i64, tpu.core_type = #tpu.core_type<tc>, window_params = [{transform_indices = @transform_0, window_bounds = array<i64: 4, 128>}, {transform_indices = @transform_1, window_bounds = array<i64: 16>}, {transform_indices = @transform_2, window_bounds = array<i64: 16>}, {transform_indices = @transform_3, window_bounds = array<i64: 16>}, {transform_indices = @transform_4, window_bounds = array<i64: 1>}, {transform_indices = @transform_5, window_bounds = array<i64: 4, 128>}]} {
    %c0 = arith.constant 0 : index
    %c0_0 = arith.constant 0 : index
    %0 = vector.load %arg1[%c0, %c0_0] : memref<4x128xf32, #tpu.memory_space<vmem>>, vector<4x128xf32>
    %1 = arith.mulf %0, %0 : vector<4x128xf32>
    %2 = tpu.iota {dimensions = array<i32: 1>} : vector<4x128xi32>
    %c2_i32 = arith.constant 2 : i32
    %c0_i32 = arith.constant 0 : i32
    %3 = arith.cmpi eq, %c2_i32, %c0_i32 : i32
    %c1_i32 = arith.constant 1 : i32
    %4 = arith.select %3, %c1_i32, %c2_i32 : i32
    %5 = vector.broadcast %4 : i32 to vector<4x128xi32>
    %6 = arith.remsi %2, %5 : vector<4x128xi32>
    %c0_i32_1 = arith.constant 0 : i32
    %7 = vector.broadcast %c0_i32_1 : i32 to vector<4x128xi32>
    %8 = arith.cmpi ne, %6, %7 : vector<4x128xi32>
    %c0_i32_2 = arith.constant 0 : i32
    %9 = vector.broadcast %c0_i32_2 : i32 to vector<4x128xi32>
    %10 = arith.cmpi slt, %6, %9 : vector<4x128xi32>
    %c0_i32_3 = arith.constant 0 : i32
    %11 = arith.cmpi slt, %4, %c0_i32_3 : i32
    %12 = vector.broadcast %11 : i1 to vector<4x128xi1>
    %13 = vector.broadcast %12 : vector<4x128xi1> to vector<4x128xi1>
    %14 = arith.xori %10, %13 : vector<4x128xi1>
    %15 = arith.andi %14, %8 : vector<4x128xi1>
    %16 = vector.broadcast %4 : i32 to vector<4x128xi32>
    %17 = arith.addi %6, %16 : vector<4x128xi32>
    %18 = arith.select %15, %17, %6 : vector<4x128xi1>, vector<4x128xi32>
    %c0_i32_4 = arith.constant 0 : i32
    %19 = vector.broadcast %c0_i32_4 : i32 to vector<4x128xi32>
    %20 = arith.cmpi eq, %18, %19 : vector<4x128xi32>
    %c127_i32 = arith.constant 127 : i32
    %21 = tpu.dynamic_rotate %1 by %c127_i32 dim 1 : vector<4x128xf32>, i32 -> vector<4x128xf32>
    %c1_i32_5 = arith.constant 1 : i32
    %22 = tpu.dynamic_rotate %1 by %c1_i32_5 dim 1 : vector<4x128xf32>, i32 -> vector<4x128xf32>
    %23 = arith.select %20, %21, %22 : vector<4x128xi1>, vector<4x128xf32>
    %24 = arith.addf %1, %23 : vector<4x128xf32>
    %c0_6 = arith.constant 0 : index
    %25 = memref.load %arg5[%c0_6] : memref<1xf32, #tpu.memory_space<smem>>
    %26 = vector.broadcast %25 : f32 to vector<4x128xf32>
    %c0_7 = arith.constant 0 : index
    %27 = memref.load %arg2[%c0_7] : memref<16xf32, #tpu.memory_space<smem>>
    %28 = vector.broadcast %27 : f32 to vector<4x128xf32>
    %29 = arith.mulf %24, %28 : vector<4x128xf32>
    %c0_8 = arith.constant 0 : index
    %30 = memref.load %arg3[%c0_8] : memref<16xf32, #tpu.memory_space<smem>>
    %31 = vector.broadcast %30 : f32 to vector<4x128xf32>
    %32 = arith.addf %29, %31 : vector<4x128xf32>
    %cst = arith.constant 5.000000e-01 : f32
    %33 = vector.broadcast %cst : f32 to vector<4x128xf32>
    %34 = arith.mulf %33, %32 : vector<4x128xf32>
    %35 = math.tanh %34 : vector<4x128xf32>
    %cst_9 = arith.constant 1.000000e+00 : f32
    %36 = vector.broadcast %cst_9 : f32 to vector<4x128xf32>
    %37 = arith.addf %35, %36 : vector<4x128xf32>
    %cst_10 = arith.constant 5.000000e-01 : f32
    %38 = vector.broadcast %cst_10 : f32 to vector<4x128xf32>
    %39 = arith.mulf %38, %37 : vector<4x128xf32>
    %c0_11 = arith.constant 0 : index
    %40 = memref.load %arg4[%c0_11] : memref<16xf32, #tpu.memory_space<smem>>
    %41 = arith.mulf %32, %39 : vector<4x128xf32>
    %42 = vector.broadcast %40 : f32 to vector<4x128xf32>
    %43 = arith.mulf %42, %41 : vector<4x128xf32>
    %44 = arith.addf %26, %43 : vector<4x128xf32>
    %c1 = arith.constant 1 : index
    %45 = memref.load %arg2[%c1] : memref<16xf32, #tpu.memory_space<smem>>
    %46 = vector.broadcast %45 : f32 to vector<4x128xf32>
    %47 = arith.mulf %24, %46 : vector<4x128xf32>
    %c1_12 = arith.constant 1 : index
    %48 = memref.load %arg3[%c1_12] : memref<16xf32, #tpu.memory_space<smem>>
    %49 = vector.broadcast %48 : f32 to vector<4x128xf32>
    %50 = arith.addf %47, %49 : vector<4x128xf32>
    %cst_13 = arith.constant 5.000000e-01 : f32
    %51 = vector.broadcast %cst_13 : f32 to vector<4x128xf32>
    %52 = arith.mulf %51, %50 : vector<4x128xf32>
    %53 = math.tanh %52 : vector<4x128xf32>
    %cst_14 = arith.constant 1.000000e+00 : f32
    %54 = vector.broadcast %cst_14 : f32 to vector<4x128xf32>
    %55 = arith.addf %53, %54 : vector<4x128xf32>
    %cst_15 = arith.constant 5.000000e-01 : f32
    %56 = vector.broadcast %cst_15 : f32 to vector<4x128xf32>
    %57 = arith.mulf %56, %55 : vector<4x128xf32>
    %c1_16 = arith.constant 1 : index
    %58 = memref.load %arg4[%c1_16] : memref<16xf32, #tpu.memory_space<smem>>
    %59 = arith.mulf %50, %57 : vector<4x128xf32>
    %60 = vector.broadcast %58 : f32 to vector<4x128xf32>
    %61 = arith.mulf %60, %59 : vector<4x128xf32>
    %62 = arith.addf %44, %61 : vector<4x128xf32>
    %c2 = arith.constant 2 : index
    %63 = memref.load %arg2[%c2] : memref<16xf32, #tpu.memory_space<smem>>
    %64 = vector.broadcast %63 : f32 to vector<4x128xf32>
    %65 = arith.mulf %24, %64 : vector<4x128xf32>
    %c2_17 = arith.constant 2 : index
    %66 = memref.load %arg3[%c2_17] : memref<16xf32, #tpu.memory_space<smem>>
    %67 = vector.broadcast %66 : f32 to vector<4x128xf32>
    %68 = arith.addf %65, %67 : vector<4x128xf32>
    %cst_18 = arith.constant 5.000000e-01 : f32
    %69 = vector.broadcast %cst_18 : f32 to vector<4x128xf32>
    %70 = arith.mulf %69, %68 : vector<4x128xf32>
    %71 = math.tanh %70 : vector<4x128xf32>
    %cst_19 = arith.constant 1.000000e+00 : f32
    %72 = vector.broadcast %cst_19 : f32 to vector<4x128xf32>
    %73 = arith.addf %71, %72 : vector<4x128xf32>
    %cst_20 = arith.constant 5.000000e-01 : f32
    %74 = vector.broadcast %cst_20 : f32 to vector<4x128xf32>
    %75 = arith.mulf %74, %73 : vector<4x128xf32>
    %c2_21 = arith.constant 2 : index
    %76 = memref.load %arg4[%c2_21] : memref<16xf32, #tpu.memory_space<smem>>
    %77 = arith.mulf %68, %75 : vector<4x128xf32>
    %78 = vector.broadcast %76 : f32 to vector<4x128xf32>
    %79 = arith.mulf %78, %77 : vector<4x128xf32>
    %80 = arith.addf %62, %79 : vector<4x128xf32>
    %c3 = arith.constant 3 : index
    %81 = memref.load %arg2[%c3] : memref<16xf32, #tpu.memory_space<smem>>
    %82 = vector.broadcast %81 : f32 to vector<4x128xf32>
    %83 = arith.mulf %24, %82 : vector<4x128xf32>
    %c3_22 = arith.constant 3 : index
    %84 = memref.load %arg3[%c3_22] : memref<16xf32, #tpu.memory_space<smem>>
    %85 = vector.broadcast %84 : f32 to vector<4x128xf32>
    %86 = arith.addf %83, %85 : vector<4x128xf32>
    %cst_23 = arith.constant 5.000000e-01 : f32
    %87 = vector.broadcast %cst_23 : f32 to vector<4x128xf32>
    %88 = arith.mulf %87, %86 : vector<4x128xf32>
    %89 = math.tanh %88 : vector<4x128xf32>
    %cst_24 = arith.constant 1.000000e+00 : f32
    %90 = vector.broadcast %cst_24 : f32 to vector<4x128xf32>
    %91 = arith.addf %89, %90 : vector<4x128xf32>
    %cst_25 = arith.constant 5.000000e-01 : f32
    %92 = vector.broadcast %cst_25 : f32 to vector<4x128xf32>
    %93 = arith.mulf %92, %91 : vector<4x128xf32>
    %c3_26 = arith.constant 3 : index
    %94 = memref.load %arg4[%c3_26] : memref<16xf32, #tpu.memory_space<smem>>
    %95 = arith.mulf %86, %93 : vector<4x128xf32>
    %96 = vector.broadcast %94 : f32 to vector<4x128xf32>
    %97 = arith.mulf %96, %95 : vector<4x128xf32>
    %98 = arith.addf %80, %97 : vector<4x128xf32>
    %c4 = arith.constant 4 : index
    %99 = memref.load %arg2[%c4] : memref<16xf32, #tpu.memory_space<smem>>
    %100 = vector.broadcast %99 : f32 to vector<4x128xf32>
    %101 = arith.mulf %24, %100 : vector<4x128xf32>
    %c4_27 = arith.constant 4 : index
    %102 = memref.load %arg3[%c4_27] : memref<16xf32, #tpu.memory_space<smem>>
    %103 = vector.broadcast %102 : f32 to vector<4x128xf32>
    %104 = arith.addf %101, %103 : vector<4x128xf32>
    %cst_28 = arith.constant 5.000000e-01 : f32
    %105 = vector.broadcast %cst_28 : f32 to vector<4x128xf32>
    %106 = arith.mulf %105, %104 : vector<4x128xf32>
    %107 = math.tanh %106 : vector<4x128xf32>
    %cst_29 = arith.constant 1.000000e+00 : f32
    %108 = vector.broadcast %cst_29 : f32 to vector<4x128xf32>
    %109 = arith.addf %107, %108 : vector<4x128xf32>
    %cst_30 = arith.constant 5.000000e-01 : f32
    %110 = vector.broadcast %cst_30 : f32 to vector<4x128xf32>
    %111 = arith.mulf %110, %109 : vector<4x128xf32>
    %c4_31 = arith.constant 4 : index
    %112 = memref.load %arg4[%c4_31] : memref<16xf32, #tpu.memory_space<smem>>
    %113 = arith.mulf %104, %111 : vector<4x128xf32>
    %114 = vector.broadcast %112 : f32 to vector<4x128xf32>
    %115 = arith.mulf %114, %113 : vector<4x128xf32>
    %116 = arith.addf %98, %115 : vector<4x128xf32>
    %c5 = arith.constant 5 : index
    %117 = memref.load %arg2[%c5] : memref<16xf32, #tpu.memory_space<smem>>
    %118 = vector.broadcast %117 : f32 to vector<4x128xf32>
    %119 = arith.mulf %24, %118 : vector<4x128xf32>
    %c5_32 = arith.constant 5 : index
    %120 = memref.load %arg3[%c5_32] : memref<16xf32, #tpu.memory_space<smem>>
    %121 = vector.broadcast %120 : f32 to vector<4x128xf32>
    %122 = arith.addf %119, %121 : vector<4x128xf32>
    %cst_33 = arith.constant 5.000000e-01 : f32
    %123 = vector.broadcast %cst_33 : f32 to vector<4x128xf32>
    %124 = arith.mulf %123, %122 : vector<4x128xf32>
    %125 = math.tanh %124 : vector<4x128xf32>
    %cst_34 = arith.constant 1.000000e+00 : f32
    %126 = vector.broadcast %cst_34 : f32 to vector<4x128xf32>
    %127 = arith.addf %125, %126 : vector<4x128xf32>
    %cst_35 = arith.constant 5.000000e-01 : f32
    %128 = vector.broadcast %cst_35 : f32 to vector<4x128xf32>
    %129 = arith.mulf %128, %127 : vector<4x128xf32>
    %c5_36 = arith.constant 5 : index
    %130 = memref.load %arg4[%c5_36] : memref<16xf32, #tpu.memory_space<smem>>
    %131 = arith.mulf %122, %129 : vector<4x128xf32>
    %132 = vector.broadcast %130 : f32 to vector<4x128xf32>
    %133 = arith.mulf %132, %131 : vector<4x128xf32>
    %134 = arith.addf %116, %133 : vector<4x128xf32>
    %c6 = arith.constant 6 : index
    %135 = memref.load %arg2[%c6] : memref<16xf32, #tpu.memory_space<smem>>
    %136 = vector.broadcast %135 : f32 to vector<4x128xf32>
    %137 = arith.mulf %24, %136 : vector<4x128xf32>
    %c6_37 = arith.constant 6 : index
    %138 = memref.load %arg3[%c6_37] : memref<16xf32, #tpu.memory_space<smem>>
    %139 = vector.broadcast %138 : f32 to vector<4x128xf32>
    %140 = arith.addf %137, %139 : vector<4x128xf32>
    %cst_38 = arith.constant 5.000000e-01 : f32
    %141 = vector.broadcast %cst_38 : f32 to vector<4x128xf32>
    %142 = arith.mulf %141, %140 : vector<4x128xf32>
    %143 = math.tanh %142 : vector<4x128xf32>
    %cst_39 = arith.constant 1.000000e+00 : f32
    %144 = vector.broadcast %cst_39 : f32 to vector<4x128xf32>
    %145 = arith.addf %143, %144 : vector<4x128xf32>
    %cst_40 = arith.constant 5.000000e-01 : f32
    %146 = vector.broadcast %cst_40 : f32 to vector<4x128xf32>
    %147 = arith.mulf %146, %145 : vector<4x128xf32>
    %c6_41 = arith.constant 6 : index
    %148 = memref.load %arg4[%c6_41] : memref<16xf32, #tpu.memory_space<smem>>
    %149 = arith.mulf %140, %147 : vector<4x128xf32>
    %150 = vector.broadcast %148 : f32 to vector<4x128xf32>
    %151 = arith.mulf %150, %149 : vector<4x128xf32>
    %152 = arith.addf %134, %151 : vector<4x128xf32>
    %c7 = arith.constant 7 : index
    %153 = memref.load %arg2[%c7] : memref<16xf32, #tpu.memory_space<smem>>
    %154 = vector.broadcast %153 : f32 to vector<4x128xf32>
    %155 = arith.mulf %24, %154 : vector<4x128xf32>
    %c7_42 = arith.constant 7 : index
    %156 = memref.load %arg3[%c7_42] : memref<16xf32, #tpu.memory_space<smem>>
    %157 = vector.broadcast %156 : f32 to vector<4x128xf32>
    %158 = arith.addf %155, %157 : vector<4x128xf32>
    %cst_43 = arith.constant 5.000000e-01 : f32
    %159 = vector.broadcast %cst_43 : f32 to vector<4x128xf32>
    %160 = arith.mulf %159, %158 : vector<4x128xf32>
    %161 = math.tanh %160 : vector<4x128xf32>
    %cst_44 = arith.constant 1.000000e+00 : f32
    %162 = vector.broadcast %cst_44 : f32 to vector<4x128xf32>
    %163 = arith.addf %161, %162 : vector<4x128xf32>
    %cst_45 = arith.constant 5.000000e-01 : f32
    %164 = vector.broadcast %cst_45 : f32 to vector<4x128xf32>
    %165 = arith.mulf %164, %163 : vector<4x128xf32>
    %c7_46 = arith.constant 7 : index
    %166 = memref.load %arg4[%c7_46] : memref<16xf32, #tpu.memory_space<smem>>
    %167 = arith.mulf %158, %165 : vector<4x128xf32>
    %168 = vector.broadcast %166 : f32 to vector<4x128xf32>
    %169 = arith.mulf %168, %167 : vector<4x128xf32>
    %170 = arith.addf %152, %169 : vector<4x128xf32>
    %c8 = arith.constant 8 : index
    %171 = memref.load %arg2[%c8] : memref<16xf32, #tpu.memory_space<smem>>
    %172 = vector.broadcast %171 : f32 to vector<4x128xf32>
    %173 = arith.mulf %24, %172 : vector<4x128xf32>
    %c8_47 = arith.constant 8 : index
    %174 = memref.load %arg3[%c8_47] : memref<16xf32, #tpu.memory_space<smem>>
    %175 = vector.broadcast %174 : f32 to vector<4x128xf32>
    %176 = arith.addf %173, %175 : vector<4x128xf32>
    %cst_48 = arith.constant 5.000000e-01 : f32
    %177 = vector.broadcast %cst_48 : f32 to vector<4x128xf32>
    %178 = arith.mulf %177, %176 : vector<4x128xf32>
    %179 = math.tanh %178 : vector<4x128xf32>
    %cst_49 = arith.constant 1.000000e+00 : f32
    %180 = vector.broadcast %cst_49 : f32 to vector<4x128xf32>
    %181 = arith.addf %179, %180 : vector<4x128xf32>
    %cst_50 = arith.constant 5.000000e-01 : f32
    %182 = vector.broadcast %cst_50 : f32 to vector<4x128xf32>
    %183 = arith.mulf %182, %181 : vector<4x128xf32>
    %c8_51 = arith.constant 8 : index
    %184 = memref.load %arg4[%c8_51] : memref<16xf32, #tpu.memory_space<smem>>
    %185 = arith.mulf %176, %183 : vector<4x128xf32>
    %186 = vector.broadcast %184 : f32 to vector<4x128xf32>
    %187 = arith.mulf %186, %185 : vector<4x128xf32>
    %188 = arith.addf %170, %187 : vector<4x128xf32>
    %c9 = arith.constant 9 : index
    %189 = memref.load %arg2[%c9] : memref<16xf32, #tpu.memory_space<smem>>
    %190 = vector.broadcast %189 : f32 to vector<4x128xf32>
    %191 = arith.mulf %24, %190 : vector<4x128xf32>
    %c9_52 = arith.constant 9 : index
    %192 = memref.load %arg3[%c9_52] : memref<16xf32, #tpu.memory_space<smem>>
    %193 = vector.broadcast %192 : f32 to vector<4x128xf32>
    %194 = arith.addf %191, %193 : vector<4x128xf32>
    %cst_53 = arith.constant 5.000000e-01 : f32
    %195 = vector.broadcast %cst_53 : f32 to vector<4x128xf32>
    %196 = arith.mulf %195, %194 : vector<4x128xf32>
    %197 = math.tanh %196 : vector<4x128xf32>
    %cst_54 = arith.constant 1.000000e+00 : f32
    %198 = vector.broadcast %cst_54 : f32 to vector<4x128xf32>
    %199 = arith.addf %197, %198 : vector<4x128xf32>
    %cst_55 = arith.constant 5.000000e-01 : f32
    %200 = vector.broadcast %cst_55 : f32 to vector<4x128xf32>
    %201 = arith.mulf %200, %199 : vector<4x128xf32>
    %c9_56 = arith.constant 9 : index
    %202 = memref.load %arg4[%c9_56] : memref<16xf32, #tpu.memory_space<smem>>
    %203 = arith.mulf %194, %201 : vector<4x128xf32>
    %204 = vector.broadcast %202 : f32 to vector<4x128xf32>
    %205 = arith.mulf %204, %203 : vector<4x128xf32>
    %206 = arith.addf %188, %205 : vector<4x128xf32>
    %c10 = arith.constant 10 : index
    %207 = memref.load %arg2[%c10] : memref<16xf32, #tpu.memory_space<smem>>
    %208 = vector.broadcast %207 : f32 to vector<4x128xf32>
    %209 = arith.mulf %24, %208 : vector<4x128xf32>
    %c10_57 = arith.constant 10 : index
    %210 = memref.load %arg3[%c10_57] : memref<16xf32, #tpu.memory_space<smem>>
    %211 = vector.broadcast %210 : f32 to vector<4x128xf32>
    %212 = arith.addf %209, %211 : vector<4x128xf32>
    %cst_58 = arith.constant 5.000000e-01 : f32
    %213 = vector.broadcast %cst_58 : f32 to vector<4x128xf32>
    %214 = arith.mulf %213, %212 : vector<4x128xf32>
    %215 = math.tanh %214 : vector<4x128xf32>
    %cst_59 = arith.constant 1.000000e+00 : f32
    %216 = vector.broadcast %cst_59 : f32 to vector<4x128xf32>
    %217 = arith.addf %215, %216 : vector<4x128xf32>
    %cst_60 = arith.constant 5.000000e-01 : f32
    %218 = vector.broadcast %cst_60 : f32 to vector<4x128xf32>
    %219 = arith.mulf %218, %217 : vector<4x128xf32>
    %c10_61 = arith.constant 10 : index
    %220 = memref.load %arg4[%c10_61] : memref<16xf32, #tpu.memory_space<smem>>
    %221 = arith.mulf %212, %219 : vector<4x128xf32>
    %222 = vector.broadcast %220 : f32 to vector<4x128xf32>
    %223 = arith.mulf %222, %221 : vector<4x128xf32>
    %224 = arith.addf %206, %223 : vector<4x128xf32>
    %c11 = arith.constant 11 : index
    %225 = memref.load %arg2[%c11] : memref<16xf32, #tpu.memory_space<smem>>
    %226 = vector.broadcast %225 : f32 to vector<4x128xf32>
    %227 = arith.mulf %24, %226 : vector<4x128xf32>
    %c11_62 = arith.constant 11 : index
    %228 = memref.load %arg3[%c11_62] : memref<16xf32, #tpu.memory_space<smem>>
    %229 = vector.broadcast %228 : f32 to vector<4x128xf32>
    %230 = arith.addf %227, %229 : vector<4x128xf32>
    %cst_63 = arith.constant 5.000000e-01 : f32
    %231 = vector.broadcast %cst_63 : f32 to vector<4x128xf32>
    %232 = arith.mulf %231, %230 : vector<4x128xf32>
    %233 = math.tanh %232 : vector<4x128xf32>
    %cst_64 = arith.constant 1.000000e+00 : f32
    %234 = vector.broadcast %cst_64 : f32 to vector<4x128xf32>
    %235 = arith.addf %233, %234 : vector<4x128xf32>
    %cst_65 = arith.constant 5.000000e-01 : f32
    %236 = vector.broadcast %cst_65 : f32 to vector<4x128xf32>
    %237 = arith.mulf %236, %235 : vector<4x128xf32>
    %c11_66 = arith.constant 11 : index
    %238 = memref.load %arg4[%c11_66] : memref<16xf32, #tpu.memory_space<smem>>
    %239 = arith.mulf %230, %237 : vector<4x128xf32>
    %240 = vector.broadcast %238 : f32 to vector<4x128xf32>
    %241 = arith.mulf %240, %239 : vector<4x128xf32>
    %242 = arith.addf %224, %241 : vector<4x128xf32>
    %c12 = arith.constant 12 : index
    %243 = memref.load %arg2[%c12] : memref<16xf32, #tpu.memory_space<smem>>
    %244 = vector.broadcast %243 : f32 to vector<4x128xf32>
    %245 = arith.mulf %24, %244 : vector<4x128xf32>
    %c12_67 = arith.constant 12 : index
    %246 = memref.load %arg3[%c12_67] : memref<16xf32, #tpu.memory_space<smem>>
    %247 = vector.broadcast %246 : f32 to vector<4x128xf32>
    %248 = arith.addf %245, %247 : vector<4x128xf32>
    %cst_68 = arith.constant 5.000000e-01 : f32
    %249 = vector.broadcast %cst_68 : f32 to vector<4x128xf32>
    %250 = arith.mulf %249, %248 : vector<4x128xf32>
    %251 = math.tanh %250 : vector<4x128xf32>
    %cst_69 = arith.constant 1.000000e+00 : f32
    %252 = vector.broadcast %cst_69 : f32 to vector<4x128xf32>
    %253 = arith.addf %251, %252 : vector<4x128xf32>
    %cst_70 = arith.constant 5.000000e-01 : f32
    %254 = vector.broadcast %cst_70 : f32 to vector<4x128xf32>
    %255 = arith.mulf %254, %253 : vector<4x128xf32>
    %c12_71 = arith.constant 12 : index
    %256 = memref.load %arg4[%c12_71] : memref<16xf32, #tpu.memory_space<smem>>
    %257 = arith.mulf %248, %255 : vector<4x128xf32>
    %258 = vector.broadcast %256 : f32 to vector<4x128xf32>
    %259 = arith.mulf %258, %257 : vector<4x128xf32>
    %260 = arith.addf %242, %259 : vector<4x128xf32>
    %c13 = arith.constant 13 : index
    %261 = memref.load %arg2[%c13] : memref<16xf32, #tpu.memory_space<smem>>
    %262 = vector.broadcast %261 : f32 to vector<4x128xf32>
    %263 = arith.mulf %24, %262 : vector<4x128xf32>
    %c13_72 = arith.constant 13 : index
    %264 = memref.load %arg3[%c13_72] : memref<16xf32, #tpu.memory_space<smem>>
    %265 = vector.broadcast %264 : f32 to vector<4x128xf32>
    %266 = arith.addf %263, %265 : vector<4x128xf32>
    %cst_73 = arith.constant 5.000000e-01 : f32
    %267 = vector.broadcast %cst_73 : f32 to vector<4x128xf32>
    %268 = arith.mulf %267, %266 : vector<4x128xf32>
    %269 = math.tanh %268 : vector<4x128xf32>
    %cst_74 = arith.constant 1.000000e+00 : f32
    %270 = vector.broadcast %cst_74 : f32 to vector<4x128xf32>
    %271 = arith.addf %269, %270 : vector<4x128xf32>
    %cst_75 = arith.constant 5.000000e-01 : f32
    %272 = vector.broadcast %cst_75 : f32 to vector<4x128xf32>
    %273 = arith.mulf %272, %271 : vector<4x128xf32>
    %c13_76 = arith.constant 13 : index
    %274 = memref.load %arg4[%c13_76] : memref<16xf32, #tpu.memory_space<smem>>
    %275 = arith.mulf %266, %273 : vector<4x128xf32>
    %276 = vector.broadcast %274 : f32 to vector<4x128xf32>
    %277 = arith.mulf %276, %275 : vector<4x128xf32>
    %278 = arith.addf %260, %277 : vector<4x128xf32>
    %c14 = arith.constant 14 : index
    %279 = memref.load %arg2[%c14] : memref<16xf32, #tpu.memory_space<smem>>
    %280 = vector.broadcast %279 : f32 to vector<4x128xf32>
    %281 = arith.mulf %24, %280 : vector<4x128xf32>
    %c14_77 = arith.constant 14 : index
    %282 = memref.load %arg3[%c14_77] : memref<16xf32, #tpu.memory_space<smem>>
    %283 = vector.broadcast %282 : f32 to vector<4x128xf32>
    %284 = arith.addf %281, %283 : vector<4x128xf32>
    %cst_78 = arith.constant 5.000000e-01 : f32
    %285 = vector.broadcast %cst_78 : f32 to vector<4x128xf32>
    %286 = arith.mulf %285, %284 : vector<4x128xf32>
    %287 = math.tanh %286 : vector<4x128xf32>
    %cst_79 = arith.constant 1.000000e+00 : f32
    %288 = vector.broadcast %cst_79 : f32 to vector<4x128xf32>
    %289 = arith.addf %287, %288 : vector<4x128xf32>
    %cst_80 = arith.constant 5.000000e-01 : f32
    %290 = vector.broadcast %cst_80 : f32 to vector<4x128xf32>
    %291 = arith.mulf %290, %289 : vector<4x128xf32>
    %c14_81 = arith.constant 14 : index
    %292 = memref.load %arg4[%c14_81] : memref<16xf32, #tpu.memory_space<smem>>
    %293 = arith.mulf %284, %291 : vector<4x128xf32>
    %294 = vector.broadcast %292 : f32 to vector<4x128xf32>
    %295 = arith.mulf %294, %293 : vector<4x128xf32>
    %296 = arith.addf %278, %295 : vector<4x128xf32>
    %c15 = arith.constant 15 : index
    %297 = memref.load %arg2[%c15] : memref<16xf32, #tpu.memory_space<smem>>
    %298 = vector.broadcast %297 : f32 to vector<4x128xf32>
    %299 = arith.mulf %24, %298 : vector<4x128xf32>
    %c15_82 = arith.constant 15 : index
    %300 = memref.load %arg3[%c15_82] : memref<16xf32, #tpu.memory_space<smem>>
    %301 = vector.broadcast %300 : f32 to vector<4x128xf32>
    %302 = arith.addf %299, %301 : vector<4x128xf32>
    %cst_83 = arith.constant 5.000000e-01 : f32
    %303 = vector.broadcast %cst_83 : f32 to vector<4x128xf32>
    %304 = arith.mulf %303, %302 : vector<4x128xf32>
    %305 = math.tanh %304 : vector<4x128xf32>
    %cst_84 = arith.constant 1.000000e+00 : f32
    %306 = vector.broadcast %cst_84 : f32 to vector<4x128xf32>
    %307 = arith.addf %305, %306 : vector<4x128xf32>
    %cst_85 = arith.constant 5.000000e-01 : f32
    %308 = vector.broadcast %cst_85 : f32 to vector<4x128xf32>
    %309 = arith.mulf %308, %307 : vector<4x128xf32>
    %c15_86 = arith.constant 15 : index
    %310 = memref.load %arg4[%c15_86] : memref<16xf32, #tpu.memory_space<smem>>
    %311 = arith.mulf %302, %309 : vector<4x128xf32>
    %312 = vector.broadcast %310 : f32 to vector<4x128xf32>
    %313 = arith.mulf %312, %311 : vector<4x128xf32>
    %314 = arith.addf %296, %313 : vector<4x128xf32>
    %315 = arith.mulf %0, %314 : vector<4x128xf32>
    %c0_87 = arith.constant 0 : index
    %c0_88 = arith.constant 0 : index
    %316 = vector.load %arg6[%c0_87, %c0_88] : memref<4x128xf32, #tpu.memory_space<vmem>>, vector<4x128xf32>
    tpu.vector_store %arg6[%c0_87, %c0_88], %315 {strides = array<i32>} : memref<4x128xf32, #tpu.memory_space<vmem>>, vector<4x128xf32>,
    return
  }
  func.func @transform_0(%arg0: i32) -> (i32, i32) {
    %c0_i32 = arith.constant 0 : i32
    %c0_i32_0 = arith.constant 0 : i32
    return %arg0, %c0_i32 : i32, i32
  }
  func.func @transform_1(%arg0: i32) -> i32 {
    %c0_i32 = arith.constant 0 : i32
    %c0_i32_0 = arith.constant 0 : i32
    return %c0_i32 : i32
  }
  func.func @transform_2(%arg0: i32) -> i32 {
    %c0_i32 = arith.constant 0 : i32
    %c0_i32_0 = arith.constant 0 : i32
    return %c0_i32 : i32
  }
  func.func @transform_3(%arg0: i32) -> i32 {
    %c0_i32 = arith.constant 0 : i32
    %c0_i32_0 = arith.constant 0 : i32
    return %c0_i32 : i32
  }
  func.func @transform_4(%arg0: i32) -> i32 {
    %c0_i32 = arith.constant 0 : i32
    %c0_i32_0 = arith.constant 0 : i32
    return %c0_i32 : i32
  }
  func.func @transform_5(%arg0: i32) -> (i32, i32) {
    %c0_i32 = arith.constant 0 : i32
    %c0_i32_0 = arith.constant 0 : i32
    return %arg0, %c0_i32 : i32, i32
  }
}

</mosaic_0001>

<bundles_post_ra>
// kernel: tpu_custom_call.1
= control target key start
LH: loop header
LB: loop body
LE: loop exit
PB: predicated region body
PF: predicated region fallthrough
CT: control target
= control target key end

     0   :  { %11 = vsyncpa [#allocation4], 0  ;;  %s827_s0 = inlined_call_operand.hbm [shape: f32[4,128], index: 0, kind: input, shape index: {}]   ;;  %s828_s1 = inlined_call_operand.vmem [shape: f32[16], index: 1, kind: input, shape index: {}]   ;;  %s829_s2 = inlined_call_operand.vmem [shape: f32[16], index: 2, kind: input, shape index: {}]   ;;  %s830_s3 = inlined_call_operand.vmem [shape: f32[16], index: 3, kind: input, shape index: {}]   ;;  %s831_s4 = inlined_call_operand.<no memory space> [shape: f32[1], index: 4, kind: input, shape index: {}]   ;;  %s832_s5 = inlined_call_operand.hbm [shape: f32[4,128], index: 5, kind: output, shape index: {}]  }
   0x1   :  { %12 = vsyncpa [#allocation6], 0 }
   0x2   :  { %13 = vsyncpa [#allocation9], 0  ;;  %s41_s20 = sshll.u32 %s829_s2, 4  ;;  %s42_s20 = int_to_ptr.vmem [resolvable:$true] %s41_s20 }
   0x3   :  { %14 = vsyncpa [#allocation5], 0  ;;  %s438_s21 = scalar_lea.vmem %s42_s20, 16  ;;  %p443_p1 = scmp.lt.s32.totalorder %s42_s20, %s42_s20 }
   0x4   :  { %p439_p0 = scmp.ne.s32.totalorder %s42_s20, %s438_s21  ;;  %p444_p2 = scmp.lt.s32.totalorder %s438_s21, %s438_s21 }
   0x6   :  { %p445_p3 = por %p444_p2, %p443_p1 }
   0x8   :  { %p446_p4 = pnand %p445_p3, %p439_p0 }
   0xa   :  { %449 = shalt.err (!%p446_p4)
}
   0xb   :  { %s526_s22 = smov [#allocation8]   ;;  %s527_s23 = smov [#allocation3]  }
   0xc   :  { %44 = dma.vmem_to_smem %s42_s20, 16, %s526_s22, [#allocation9]  }
   0xd   :  { %s21_s24 = sshll.u32 %s527_s23, 4  ;;  %s31_s27 = sshll.u32 %s828_s1, 4  ;;  %s22_s24 = int_to_ptr.vmem [resolvable:$true] %s21_s24  ;;  %s32_s27 = int_to_ptr.vmem [resolvable:$true] %s31_s27 }
   0xe   :  { %s450_s29 = scalar_lea.hbm %s827_s0, 64 }
   0xf   :  { %p451_p5 = scmp.ne.s32.totalorder %s827_s0, %s450_s29  ;;  %p454_p6 = scmp.lt.u32.totalorder %s450_s29, %s827_s0 }
  0x11   :  { %p456_p7 = pnand %p454_p6, %p451_p5 }
  0x13   :  { %459 = shalt.err (!%p456_p7)
}
  0x14   :  { %s460_s9 = scalar_lea.vmem %s22_s24, 64  ;;  %p465_p9 = scmp.lt.s32.totalorder %s22_s24, %s22_s24 }
  0x15   :  { %p461_p8 = scmp.ne.s32.totalorder %s22_s24, %s460_s9  ;;  %p466_p10 = scmp.lt.s32.totalorder %s460_s9, %s460_s9 }
  0x17   :  { %p467_p11 = por %p466_p10, %p465_p9 }
  0x19   :  { %p468_p12 = pnand %p467_p11, %p461_p8 }
  0x1b   :  { %471 = shalt.err (!%p468_p12)
}
  0x1c   :  { %24 = dma.hbm_to_vmem [thread:$0]  %s827_s0, 64, %s22_s24, [#allocation4]  }
  0x1d   :  { %s51_s13 = sshll.u32 %s830_s3, 4  ;;  %s472_s14 = scalar_lea.vmem %s32_s27, 16  ;;  %s52_s13 = int_to_ptr.vmem [resolvable:$true] %s51_s13 }
  0x1e   :  { %p473_p13 = scmp.ne.s32.totalorder %s32_s27, %s472_s14  ;;  %p477_p0 = scmp.lt.s32.totalorder %s32_s27, %s32_s27 }
  0x1f   :  { %p478_p1 = scmp.lt.s32.totalorder %s472_s14, %s472_s14 }
  0x21   :  { %p479_p2 = por %p478_p1, %p477_p0 }
  0x23   :  { %p480_p3 = pnand %p479_p2, %p473_p13 }
  0x25   :  { %483 = shalt.err (!%p480_p3)
}
  0x26   :  { %s528_s15 = smov [#allocation7]   ;;  %s484_s16 = scalar_lea.vmem %s52_s13, 16 }
  0x27   :  { %34 = dma.vmem_to_smem %s32_s27, 16, %s528_s15, [#allocation6]  }
  0x28   :  { %p485_p4 = scmp.ne.s32.totalorder %s52_s13, %s484_s16  ;;  %p489_p5 = scmp.lt.s32.totalorder %s52_s13, %s52_s13 }
  0x29   :  { %p490_p6 = scmp.lt.s32.totalorder %s484_s16, %s484_s16 }
  0x2b   :  { %p491_p7 = por %p490_p6, %p489_p5 }
  0x2d   :  { %p492_p8 = pnand %p491_p7, %p485_p4 }
  0x2f   :  { %495 = shalt.err (!%p492_p8)
}
  0x30   :  { %s529_s0 = smov [#allocation10]  }
  0x31   :  { %54 = dma.vmem_to_smem %s52_s13, 16, %s529_s0, [#allocation9]  }
  0x32   :  { %518 = dma.done.wait [#allocation4], 64  }
  0x33   :  { %519 = vsyncadd [#allocation4], 4294967232 }
  0x34   :  { %520 = dma.done.wait [#allocation6], 16  }
  0x35   :  { %521 = vsyncadd [#allocation6], 4294967280 }
  0x36   :  { %522 = dma.done.wait [#allocation9], 32  }
  0x37   :  { %523 = vsyncadd [#allocation9], 4294967264 }
  0x38   :  { %69 = sfence }
  0x39   :  { %v584_v0 = vld [vmem:[#allocation3] sm:$0xf]  ;;  %s530_s3 = smov 127   ;;  %s531_s17 = smov 1   ;;  %v72_v2 = vlaneseq }
  0x3a   :  { %v71_v1 = vmul.f32 %v584_v0, %v584_v0  ;;  %s588_s18 = sld [smem:[#allocation7]]  ;;  %s592_s20 = sld [smem:[#allocation7 + $0x1]] }
  0x3b   :  { %s590_s19 = sld [smem:[#allocation8]]  ;;  %s594_s21 = sld [smem:[#allocation8 + $0x1]]  ;;  %v73_v3 = vand.u32 127, %v72_v2 }
  0x3c   :  { %87 = vrot.lane.b32.xlu0 %v71_v1, %s530_s3  ;;  %s596_s22 = sld [smem:[#allocation7 + $0x2]]  ;;  %s600_s24 = sld [smem:[#allocation7 + $0x3]] }
  0x3d   :  { %s598_s23 = sld [smem:[#allocation8 + $0x2]]  ;;  %s602_s25 = sld [smem:[#allocation8 + $0x3]]  ;;  %v78_v4 = vand.u32 1, %v73_v3 }
  0x3e   :  { %s604_s26 = sld [smem:[#allocation7 + $0x4]]  ;;  %s608_s2 = sld [smem:[#allocation7 + $0x5]] }
  0x3f   :  { %s606_s27 = sld [smem:[#allocation8 + $0x4]]  ;;  %s610_s28 = sld [smem:[#allocation8 + $0x5]]  ;;  %vm630_vm0 = vcmp.eq.s32.totalorder %v78_v4, 0 }
  0x40   :  { %89 = vrot.lane.b32.xlu0 %v71_v1, %s531_s17  ;;  %s612_s29 = sld [smem:[#allocation7 + $0x6]]  ;;  %s616_s6 = sld [smem:[#allocation7 + $0x7]]  ;;  %v96_v7 = vstv %s588_s18  ;;  %v111_v9 = vstv %s592_s20 }
  0x41   :  { %s614_s30 = sld [smem:[#allocation8 + $0x6]]  ;;  %s618_s7 = sld [smem:[#allocation8 + $0x7]]  ;;  %v99_v8 = vstv %s590_s19  ;;  %v114_v10 = vstv %s594_s21 }
  0x42   :  { %s620_s8 = sld [smem:[#allocation7 + $0x8]]  ;;  %s624_s1 = sld [smem:[#allocation7 + $0x9]]  ;;  %v126_v11 = vstv %s596_s22  ;;  %v141_v13 = vstv %s600_s24 }
  0x43   :  { %s622_s9 = sld [smem:[#allocation8 + $0x8]]  ;;  %s626_s10 = sld [smem:[#allocation8 + $0x9]]  ;;  %v129_v12 = vstv %s598_s23  ;;  %v144_v15 = vstv %s602_s25 }
  0x44   :  { %s628_s11 = sld [smem:[#allocation7 + $0xa]]  ;;  %v156_v16 = vstv %s604_s26  ;;  %v171_v18 = vstv %s608_s2  ;;  %s647_s13 = sld [smem:[#allocation7 + $0xb]] }
  0x45   :  { %s641_s12 = sld [smem:[#allocation8 + $0xa]]  ;;  %v159_v17 = vstv %s606_s27  ;;  %v174_v20 = vstv %s610_s28  ;;  %s654_s14 = sld [smem:[#allocation7 + $0xc]] }
  0x46   :  { %v186_v21 = vstv %s612_s29  ;;  %v201_v24 = vstv %s616_s6  ;;  %s665_s15 = sld [smem:[#allocation7 + $0xd]]  ;;  %s675_s16 = sld [smem:[#allocation8 + $0xb]] }
  0x47   :  { %v189_v22 = vstv %s614_s30  ;;  %v204_v25 = vstv %s618_s7  ;;  %s677_s0 = sld [smem:[#allocation7 + $0xe]]  ;;  %s694_s3 = sld [smem:[#allocation8 + $0xc]] }
  0x48   :  { %v216_v26 = vstv %s620_s8  ;;  %v231_v28 = vstv %s624_s1  ;;  %s700_s17 = sld [smem:[#allocation8 + $0xd]]  ;;  %s707_s18 = sld [smem:[#allocation7 + $0xf]] }
  0x49   :  { %v219_v27 = vstv %s622_s9  ;;  %v234_v29 = vstv %s626_s10  ;;  %s712_s19 = sld [smem:[#allocation8 + $0xe]]  ;;  %s725_s20 = sld [smem:[#allocation8 + $0xf]] }
  0x4a   :  { %v246_v30 = vstv %s628_s11  ;;  %v261_v50 = vstv %s647_s13  ;;  %s727_s21 = sld [smem:[#allocation10]]  ;;  %s733_s22 = sld [smem:[#allocation10 + $0x1]] }
  0x4b   :  { %v249_v46 = vstv %s641_s12  ;;  %v276_v54 = vstv %s654_s14  ;;  %s749_s23 = sld [smem:[#allocation10 + $0x2]]  ;;  %s760_s26 = sld [smem:[#allocation10 + $0x3]] }
  0x4c   :  { %v291_v60 = vstv %s665_s15  ;;  %v264_v2 = vstv %s675_s16  ;;  %s772_s27 = sld [smem:[#allocation10 + $0x5]]  ;;  %s776_s2 = sld [smem:[#allocation10 + $0x6]] }
  0x4d   :  { %v306_v3 = vstv %s677_s0  ;;  %s781_s28 = sld [smem:[#allocation10 + $0x7]]  ;;  %s783_s29 = sld [smem:[#allocation10 + $0x8]] }
  0x4e   :  { %s787_s30 = sld [smem:[#allocation10 + $0x9]]  ;;  %s793_s6 = sld [smem:[#allocation10 + $0xa]] }
  0x4f   :  { %s799_s7 = sld [smem:[#allocation10 + $0xb]]  ;;  %s803_s8 = sld [smem:[#allocation10 + $0xc]] }
  0x50   :  { %s392_s9 = sld [smem:[#allocation10 + $0xd]]  ;;  %s395_s1 = sld [smem:[#allocation10 + $0xe]] }
  0x51   :  { %s398_s10 = sld [smem:[#allocation10 + $0xf]]  ;;  %s532_s11 = smov [#allocation11]  }
  0x52   :  { %s343_s12 = sshll.u32 %s532_s11, 4  ;;  %s344_s12 = int_to_ptr.vmem [resolvable:$true] %s343_s12 }
  0x53   :  { %s496_s13 = scalar_lea.vmem %s344_s12, 64  ;;  %p501_p10 = scmp.lt.s32.totalorder %s344_s12, %s344_s12 }
  0x54   :  { %p497_p9 = scmp.ne.s32.totalorder %s344_s12, %s496_s13  ;;  %p502_p11 = scmp.lt.s32.totalorder %s496_s13, %s496_s13 }
  0x56   :  { %p503_p12 = por %p502_p11, %p501_p10 }
  0x58   :  { %p504_p13 = pnand %p503_p12, %p497_p9 }
  0xae   :  { %v88_v5 = vpop.permute.xlu0 %87 }
  0xb2   :  { %v90_v14 = vpop.permute.xlu0 %89 }
  0xb3   :  { %v91_v19 = vsel %vm630_vm0, %v88_v5, %v90_v14 }
  0xb4   :  { %v656_v23 = vadd.f32 %v91_v19, %v71_v1 }
  0xb6   :  { %v97_v31 = vmul.f32 %v96_v7, %v656_v23  ;;  %v112_v32 = vmul.f32 %v111_v9, %v656_v23  ;;  %v127_v33 = vmul.f32 %v126_v11, %v656_v23  ;;  %v142_v34 = vmul.f32 %v141_v13, %v656_v23 }
  0xb7   :  { %v157_v35 = vmul.f32 %v156_v16, %v656_v23  ;;  %v172_v36 = vmul.f32 %v171_v18, %v656_v23  ;;  %v187_v37 = vmul.f32 %v186_v21, %v656_v23  ;;  %v202_v38 = vmul.f32 %v201_v24, %v656_v23 }
  0xb8   :  { %v679_v39 = vadd.f32 %v99_v8, %v97_v31  ;;  %v681_v40 = vadd.f32 %v114_v10, %v112_v32  ;;  %v683_v41 = vadd.f32 %v129_v12, %v127_v33  ;;  %v685_v42 = vadd.f32 %v144_v15, %v142_v34 }
  0xb9   :  { %v687_v43 = vadd.f32 %v159_v17, %v157_v35  ;;  %v689_v44 = vadd.f32 %v174_v20, %v172_v36  ;;  %v691_v45 = vadd.f32 %v189_v22, %v187_v37  ;;  %v704_v53 = vadd.f32 %v204_v25, %v202_v38 }
  0xba   :  { %v101_v47 = vmul.f32 0.5, %v679_v39  ;;  %v116_v48 = vmul.f32 0.5, %v681_v40  ;;  %v131_v49 = vmul.f32 0.5, %v683_v41  ;;  %v146_v51 = vmul.f32 0.5, %v685_v42 }
  0xbb   :  { %v161_v52 = vmul.f32 0.5, %v687_v43  ;;  %v217_v55 = vmul.f32 %v216_v26, %v656_v23  ;;  %v232_v56 = vmul.f32 %v231_v28, %v656_v23  ;;  %v247_v57 = vmul.f32 %v246_v30, %v656_v23 }
  0xbc   :  { %406 = vtanh.f32 %v101_v47  ;;  %v176_v58 = vmul.f32 0.5, %v689_v44  ;;  %v191_v59 = vmul.f32 0.5, %v691_v45  ;;  %v262_v63 = vmul.f32 %v261_v50, %v656_v23 }
  0xbd   :  { %408 = vtanh.f32 %v116_v48  ;;  %v717_v61 = vadd.f32 %v219_v27, %v217_v55  ;;  %v719_v62 = vadd.f32 %v234_v29, %v232_v56  ;;  %v206_v1 = vmul.f32 0.5, %v704_v53 }
  0xbe   :  { %410 = vtanh.f32 %v131_v49  ;;  %v730_v5 = vadd.f32 %v249_v46, %v247_v57  ;;  %v277_v6 = vmul.f32 %v276_v54, %v656_v23  ;;  %v279_v8 = vstv %s694_s3 }
  0xbf   :  { %412 = vtanh.f32 %v146_v51  ;;  %v221_v4 = vmul.f32 0.5, %v717_v61  ;;  %v236_v7 = vmul.f32 0.5, %v719_v62  ;;  %v292_v9 = vmul.f32 %v291_v60, %v656_v23 }
  0xc0   :  { %414 = vtanh.f32 %v161_v52  ;;  %v738_v10 = vadd.f32 %v264_v2, %v262_v63  ;;  %v294_v11 = vstv %s700_s17  ;;  %v307_v12 = vmul.f32 %v306_v3, %v656_v23 }
  0xc1   :  { %416 = vtanh.f32 %v176_v58  ;;  %v321_v13 = vstv %s707_s18  ;;  %v251_v14 = vmul.f32 0.5, %v730_v5  ;;  %v744_v15 = vadd.f32 %v279_v8, %v277_v6 }
  0xc2   :  { %418 = vtanh.f32 %v191_v59  ;;  %v309_v16 = vstv %s712_s19  ;;  %v747_v17 = vadd.f32 %v294_v11, %v292_v9  ;;  %v266_v19 = vmul.f32 0.5, %v738_v10 }
  0xc3   :  { %420 = vtanh.f32 %v206_v1  ;;  %v322_v20 = vmul.f32 %v321_v13, %v656_v23  ;;  %v94_v22 = vstv %s831_s4  ;;  %v756_v25 = vadd.f32 %v309_v16, %v307_v12  ;;  %s765_s4 = sld [smem:[#allocation10 + $0x4]] }
  0xc4   :  { %422 = vtanh.f32 %v221_v4  ;;  %v324_v26 = vstv %s725_s20  ;;  %v107_v28 = vstv %s727_s21  ;;  %v281_v30 = vmul.f32 0.5, %v744_v15 }
  0xc5   :  { %424 = vtanh.f32 %v236_v7  ;;  %v122_v23 = vstv %s733_s22  ;;  %v296_v34 = vmul.f32 0.5, %v747_v17  ;;  %v767_v38 = vadd.f32 %v324_v26, %v322_v20 }
  0xc6   :  { %v407_v18 = vpop.eup %406  ;;  %426 = vtanh.f32 %v251_v14  ;;  %v311_v50 = vmul.f32 0.5, %v756_v25  ;;  %v137_v1 = vstv %s749_s23  ;;  %v152_v8 = vstv %s760_s26 }
  0xc7   :  { %v409_v21 = vpop.eup %408  ;;  %v103_v24 = vadd.f32 1.0, %v407_v18  ;;  %428 = vtanh.f32 %v266_v19 }
  0xc8   :  { %v411_v27 = vpop.eup %410  ;;  %v118_v29 = vadd.f32 1.0, %v409_v21  ;;  %430 = vtanh.f32 %v281_v30 }
  0xc9   :  { %v413_v31 = vpop.eup %412  ;;  %v104_v32 = vmul.f32 0.5, %v103_v24  ;;  %v133_v33 = vadd.f32 1.0, %v411_v27  ;;  %432 = vtanh.f32 %v296_v34  ;;  %v167_v16 = vstv %s765_s4 }
  0xca   :  { %v415_v35 = vpop.eup %414  ;;  %v119_v36 = vmul.f32 0.5, %v118_v29  ;;  %v148_v37 = vadd.f32 1.0, %v413_v31  ;;  %434 = vtanh.f32 %v311_v50  ;;  %v182_v24 = vstv %s772_s27 }
  0xcb   :  { %v417_v46 = vpop.eup %416  ;;  %v106_v47 = vmul.f32 %v104_v32, %v679_v39  ;;  %v134_v48 = vmul.f32 0.5, %v133_v33  ;;  %v163_v49 = vadd.f32 1.0, %v415_v35  ;;  %v197_v31 = vstv %s776_s2 }
  0xcc   :  { %v419_v51 = vpop.eup %418  ;;  %v121_v52 = vmul.f32 %v119_v36, %v681_v40  ;;  %v149_v54 = vmul.f32 0.5, %v148_v37  ;;  %v178_v55 = vadd.f32 1.0, %v417_v46  ;;  %v326_v40 = vmul.f32 0.5, %v767_v38 }
  0xcd   :  { %v421_v56 = vpop.eup %420  ;;  %v108_v57 = vmul.f32 %v107_v28, %v106_v47  ;;  %v136_v58 = vmul.f32 %v134_v48, %v683_v41  ;;  %v164_v59 = vmul.f32 0.5, %v163_v49  ;;  %v193_v39 = vadd.f32 1.0, %v419_v51 }
  0xce   :  { %v423_v60 = vpop.eup %422  ;;  %v123_v63 = vmul.f32 %v122_v23, %v121_v52  ;;  %v151_v4 = vmul.f32 %v149_v54, %v685_v42  ;;  %v179_v6 = vmul.f32 0.5, %v178_v55  ;;  %v208_v7 = vadd.f32 1.0, %v421_v56 }
  0xcf   :  { %v425_v2 = vpop.eup %424  ;;  %v109_v3 = vadd.f32 %v108_v57, %v94_v22  ;;  %v223_v41 = vadd.f32 1.0, %v423_v60  ;;  %v138_v11 = vmul.f32 %v137_v1, %v136_v58  ;;  %v166_v12 = vmul.f32 %v164_v59, %v687_v43 }
  0xd0   :  { %v194_v13 = vmul.f32 0.5, %v193_v39  ;;  %v427_v14 = vpop.eup %426  ;;  %v238_v18 = vadd.f32 1.0, %v425_v2  ;;  %436 = vtanh.f32 %v326_v40  ;;  %v153_v19 = vmul.f32 %v152_v8, %v151_v4 }
  0xd1   :  { %v124_v9 = vadd.f32 %v123_v63, %v109_v3  ;;  %v181_v20 = vmul.f32 %v179_v6, %v689_v44  ;;  %v209_v21 = vmul.f32 0.5, %v208_v7  ;;  %v429_v22 = vpop.eup %428  ;;  %v224_v26 = vmul.f32 0.5, %v223_v41 }
  0xd2   :  { %v168_v43 = vmul.f32 %v167_v16, %v166_v12  ;;  %v196_v28 = vmul.f32 %v194_v13, %v691_v45  ;;  %v253_v29 = vadd.f32 1.0, %v427_v14  ;;  %v431_v30 = vpop.eup %430  ;;  %v239_v32 = vmul.f32 0.5, %v238_v18 }
  0xd3   :  { %v139_v42 = vadd.f32 %v138_v11, %v124_v9  ;;  %v183_v33 = vmul.f32 %v182_v24, %v181_v20  ;;  %v211_v44 = vmul.f32 %v209_v21, %v704_v53  ;;  %v268_v34 = vadd.f32 1.0, %v429_v22  ;;  %v433_v35 = vpop.eup %432 }
  0xd4   :  { %v212_v36 = vstv %s781_s28  ;;  %v226_v37 = vmul.f32 %v224_v26, %v717_v61  ;;  %v227_v46 = vstv %s783_s29  ;;  %v198_v47 = vmul.f32 %v197_v31, %v196_v28  ;;  %v435_v50 = vpop.eup %434 }
  0xd5   :  { %v154_v27 = vadd.f32 %v153_v19, %v139_v42  ;;  %v254_v48 = vmul.f32 0.5, %v253_v29  ;;  %v283_v49 = vadd.f32 1.0, %v431_v30  ;;  %v241_v51 = vmul.f32 %v239_v32, %v719_v62 }
  0xd6   :  { %v242_v52 = vstv %s787_s30  ;;  %v213_v54 = vmul.f32 %v212_v36, %v211_v44  ;;  %v269_v55 = vmul.f32 0.5, %v268_v34  ;;  %v298_v56 = vadd.f32 1.0, %v433_v35 }
  0xd7   :  { %v169_v23 = vadd.f32 %v168_v43, %v154_v27  ;;  %v228_v57 = vmul.f32 %v227_v46, %v226_v37  ;;  %v256_v59 = vmul.f32 %v254_v48, %v730_v5  ;;  %v284_v39 = vmul.f32 0.5, %v283_v49 }
  0xd8   :  { %v313_v60 = vadd.f32 1.0, %v435_v50  ;;  %v243_v63 = vmul.f32 %v242_v52, %v241_v51  ;;  %v257_v1 = vstv %s793_s6  ;;  %v271_v40 = vmul.f32 %v269_v55, %v738_v10 }
  0xd9   :  { %v184_v45 = vadd.f32 %v183_v33, %v169_v23  ;;  %v299_v2 = vmul.f32 0.5, %v298_v56  ;;  %v272_v4 = vstv %s799_s7  ;;  %v258_v7 = vmul.f32 %v257_v1, %v256_v59 }
  0xda   :  { %v437_v61 = vpop.eup %436  ;;  %v286_v8 = vmul.f32 %v284_v39, %v744_v15  ;;  %v314_v41 = vmul.f32 0.5, %v313_v60  ;;  %v287_v9 = vstv %s803_s8  ;;  %v273_v11 = vmul.f32 %v272_v4, %v271_v40 }
  0xdb   :  { %v199_v53 = vadd.f32 %v198_v47, %v184_v45  ;;  %v328_v3 = vadd.f32 1.0, %v437_v61  ;;  %v301_v12 = vmul.f32 %v299_v2, %v747_v17  ;;  %v302_v14 = vstv %s392_s9 }
  0xdc   :  { %v288_v18 = vmul.f32 %v287_v9, %v286_v8  ;;  %v316_v10 = vmul.f32 %v314_v41, %v756_v25  ;;  %v317_v42 = vstv %s395_s1  ;;  %v332_v22 = vstv %s398_s10 }
  0xdd   :  { %v214_v58 = vadd.f32 %v213_v54, %v199_v53  ;;  %v329_v13 = vmul.f32 0.5, %v328_v3  ;;  %v303_v20 = vmul.f32 %v302_v14, %v301_v12 }
  0xde   :  { %v318_v15 = vmul.f32 %v317_v42, %v316_v10 }
  0xdf   :  { %v229_v62 = vadd.f32 %v228_v57, %v214_v58  ;;  %v331_v21 = vmul.f32 %v329_v13, %v767_v38 }
  0xe1   :  { %v244_v6 = vadd.f32 %v243_v63, %v229_v62  ;;  %v333_v27 = vmul.f32 %v332_v22, %v331_v21 }
  0xe3   :  { %v259_v5 = vadd.f32 %v258_v7, %v244_v6 }
  0xe5   :  { %v274_v16 = vadd.f32 %v273_v11, %v259_v5 }
  0xe7   :  { %v289_v19 = vadd.f32 %v288_v18, %v274_v16 }
  0xe9   :  { %v304_v24 = vadd.f32 %v303_v20, %v289_v19 }
  0xeb   :  { %v319_v26 = vadd.f32 %v318_v15, %v304_v24 }
  0xed   :  { %v334_v43 = vadd.f32 %v333_v27, %v319_v26 }
  0xef   :  { %v335_v17 = vmul.f32 %v334_v43, %v584_v0 }
  0xf1   :  { %336 = vst [vmem:[#allocation11] sm:$0xf] %v335_v17 }
  0xf2   :  { %507 = shalt.err (!%p504_p13)
}
  0xf3   :  { %s508_s16 = scalar_lea.hbm %s832_s5, 64 }
  0xf4   :  { %p509_p0 = scmp.ne.s32.totalorder %s832_s5, %s508_s16  ;;  %p512_p1 = scmp.lt.u32.totalorder %s508_s16, %s832_s5 }
  0xf6   :  { %p514_p2 = pnand %p512_p1, %p509_p0 }
  0xf8   :  { %517 = shalt.err (!%p514_p2)
}
  0xf9   :  { %346 = dma.vmem_to_hbm [thread:$0]  %s344_s12, 64, %s832_s5, [#allocation5]  }
  0xfa   :  { %524 = dma.done.wait [#allocation5], 64  }
  0xfb   :  { %525 = vsyncadd [#allocation5], 4294967232 }
  0xfc   :  { %350 = vsyncpa [#allocation4], 1 }
  0xfd   :  { %351 = vsyncpa [#allocation5], 1 }
  0xfe   :  { %352 = vsyncpa [#allocation6], 1 }
  0xff   :  { %353 = vsyncpa [#allocation9], 1 }

</bundles_post_ra>
